<compile_context>
chip_gen: v7x
topology: tpu7x:2x2x1
jax: 0.10.0
libtpu: 0.0.40
codegen_flags: <defaults>
</compile_context>

<pallas_src>
import functools

import jax
import jax.numpy as jnp
from jax.experimental import pallas as pl
from jax.experimental.pallas import tpu as pltpu


# ----------------------------------------------------------------------------
# Kernel: one (tm, dim) x-row tile times one (dim, tn) weight-column tile.
# The LoRA deltas are already folded into the weight, so this is a plain
# GEMM + bias with f32 accumulation and a single lane-dense store.
# ----------------------------------------------------------------------------
def fused_qkv_kernel(x_ref, w_ref, b_ref, o_ref):
    acc = jnp.dot(x_ref[...], w_ref[...], preferred_element_type=jnp.float32)
    o_ref[...] = (acc + b_ref[...].astype(jnp.float32)).astype(o_ref.dtype)


def _round_up(x, m):
    return ((x + m - 1) // m) * m


def _pick_tile(total, preferred):
    """Largest of (preferred, 512, 256, 128) that divides `total` (a multiple of 128)."""
    for t in (preferred, 512, 256, 128):
        if t <= total and total % t == 0:
            return t
    return total


@functools.partial(jax.jit, static_argnames=("tm", "tn", "out_dtype"))
def pissa_s_forward(x, wqkv_t, bias, aq_t, bq_t, av_t, bv_t, *,
                    tm=256, tn=512, out_dtype=None):
    """PiSSA_S forward.

    x:       (B, N, dim)
    wqkv_t:  (dim, 3*dim)   qkv weight pre-transposed to (in, out)
    bias:    (3*dim,)       qkv bias
    aq_t:    (dim, r)       lora A_q pre-transposed
    bq_t:    (r, dim)       lora B_q pre-transposed
    av_t, bv_t: same for v
    returns: (B, N, 3*dim)
    """
    B, Ntok, dim = x.shape
    out3 = 3 * dim
    out_dtype = out_dtype or x.dtype

    # --- Fold rank-r LoRA into the dense qkv weight (once per call). -------
    # lora_q(x) = x @ (aq_t @ bq_t); adding the (dim, dim) delta to the q / v
    # column blocks makes the hot loop a single GEMM. Cost O(dim^2 * r).
    hi = jax.lax.Precision.HIGHEST
    delta_q = jnp.dot(aq_t.astype(jnp.float32), bq_t.astype(jnp.float32), precision=hi)
    delta_v = jnp.dot(av_t.astype(jnp.float32), bv_t.astype(jnp.float32), precision=hi)
    w_eff = wqkv_t.astype(jnp.float32)
    w_eff = w_eff.at[:, :dim].add(delta_q)
    w_eff = w_eff.at[:, 2 * dim:].add(delta_v)
    w_eff = w_eff.astype(wqkv_t.dtype)
    b_eff = bias.reshape(1, out3)

    # --- Pad everything to lane/sublane-friendly multiples of 128. ---------
    M = B * Ntok
    dim_p = _round_up(dim, 128)       # contraction axis
    n_p = _round_up(out3, 128)        # output columns (lane-dense stores)
    m_p = _round_up(M, 128)           # rows
    tm_eff = _pick_tile(m_p, tm)      # 128..512, divides m_p
    tn_eff = _pick_tile(n_p, tn)      # 128..512, divides n_p

    x_p = jnp.pad(x.reshape(M, dim), ((0, m_p - M), (0, dim_p - dim)))
    w_p = jnp.pad(w_eff, ((0, dim_p - dim), (0, n_p - out3)))
    b_p = jnp.pad(b_eff, ((0, 0), (0, n_p - out3)))

    grid = (m_p // tm_eff, n_p // tn_eff)

    # TODO(synk): for very large dim (contraction >> VMEM even at tn=128) add a
    # third "arbitrary" K grid axis with a VMEM accumulator.
    out = pl.pallas_call(
        fused_qkv_kernel,
        out_shape=jax.ShapeDtypeStruct((m_p, n_p), out_dtype),
        grid_spec=pltpu.PrefetchScalarGridSpec(
            num_scalar_prefetch=0,
            grid=grid,
            in_specs=[
                # x row tile: constant across the inner column axis -> reused.
                pl.BlockSpec((tm_eff, dim_p), lambda i, j: (i, 0)),
                # fused weight streamed as (dim, tn) column blocks.
                pl.BlockSpec((dim_p, tn_eff), lambda i, j: (0, j)),
                # bias column block.
                pl.BlockSpec((1, tn_eff), lambda i, j: (0, j)),
            ],
            out_specs=pl.BlockSpec((tm_eff, tn_eff), lambda i, j: (i, j)),
        ),
        compiler_params=pltpu.CompilerParams(
            dimension_semantics=("parallel", "parallel"),
            vmem_limit_bytes=64 * 1024 * 1024,
        ),
    )(x_p, w_p, b_p)

    return out[:M, :out3].reshape(B, Ntok, out3)


# ----------------------------------------------------------------------------
# Pure-JAX reference of the ORIGINAL (unfolded) formulation, in f32.
# ----------------------------------------------------------------------------
def reference_forward(x, wqkv_t, bias, aq_t, bq_t, av_t, bv_t):
    hi = jax.lax.Precision.HIGHEST
    f32 = jnp.float32
    dim = x.shape[-1]
    xf = x.astype(f32)
    qkv = jnp.einsum("bnd,de->bne", xf, wqkv_t.astype(f32), precision=hi)
    qkv = qkv + bias.astype(f32)
    lora_q = jnp.einsum(
        "bnr,rd->bnd",
        jnp.einsum("bnd,dr->bnr", xf, aq_t.astype(f32), precision=hi),
        bq_t.astype(f32), precision=hi)
    lora_v = jnp.einsum(
        "bnr,rd->bnd",
        jnp.einsum("bnd,dr->bnr", xf, av_t.astype(f32), precision=hi),
        bv_t.astype(f32), precision=hi)
    q = qkv[..., :dim] + lora_q
    k = qkv[..., dim:2 * dim]
    v = qkv[..., 2 * dim:] + lora_v
    return jnp.concatenate([q, k, v], axis=-1)


def _make_inputs(key, B, Ntok, dim, r, dtype):
    kx, kw, kb, k1, k2, k3, k4 = jax.random.split(key, 7)
    x = jax.random.normal(kx, (B, Ntok, dim), jnp.float32)
    # nn.Linear(dim, 3*dim): weight (3*dim, dim), bias (3*dim,)
    w_qkv = jax.random.normal(kw, (3 * dim, dim), jnp.float32) * 0.05
    b_qkv = jax.random.normal(kb, (3 * dim,), jnp.float32) * 0.05
    # LoRA linears (bias=False): A (r, dim), B (dim, r).
    w_aq = jax.random.normal(k1, (r, dim), jnp.float32) * 0.05
    w_bq = jax.random.normal(k2, (dim, r), jnp.float32) * 0.05
    w_av = jax.random.normal(k3, (r, dim), jnp.float32) * 0.05
    w_bv = jax.random.normal(k4, (dim, r), jnp.float32) * 0.05
    # Pre-transpose to (in, out) so the kernel does plain x @ W.
    args = (x, w_qkv.T, b_qkv, w_aq.T, w_bq.T, w_av.T, w_bv.T)
    return tuple(a.astype(dtype) for a in args)


if __name__ == "__main__":
    key = jax.random.PRNGKey(0)
    k_toy, k_big = jax.random.split(key)

    # --- Test 1: toy module shapes (B=2, N=8, dim=32, r=8), f32. ------------
    args = _make_inputs(k_toy, B=2, Ntok=8, dim=32, r=8, dtype=jnp.float32)
    out = jax.block_until_ready(pissa_s_forward(*args))
    ref = reference_forward(*args)
    assert out.shape == (2, 8, 3 * 32)
    assert jnp.allclose(out, ref, atol=2e-4, rtol=2e-4), "f32 toy mismatch"

    # --- Test 2: 128-aligned shapes, multi-tile grid, f32. ------------------
    args2 = _make_inputs(k_big, B=2, Ntok=128, dim=128, r=16, dtype=jnp.float32)
    out2 = jax.block_until_ready(pissa_s_forward(*args2))
    ref2 = reference_forward(*args2)
    assert out2.shape == (2, 128, 3 * 128)
    assert jnp.allclose(out2, ref2, atol=2e-4, rtol=2e-4), "f32 aligned mismatch"

    # --- Test 3: bf16 operands (MXU-native path), looser tolerance. ---------
    args3 = tuple(a.astype(jnp.bfloat16) for a in args2)
    out3 = jax.block_until_ready(pissa_s_forward(*args3))
    ref3 = reference_forward(*args3)
    assert jnp.allclose(out3.astype(jnp.float32), ref3, atol=3e-2, rtol=3e-2), \
        "bf16 mismatch"

    print("KERNEL_OK")
</pallas_src>

<mosaic_0001>
module attributes {stable_mosaic.version = 11 : i64} {
  func.func @fused_qkv_kernel(%arg0: i32, %arg1: i32, %arg2: memref<128x128xf32, #tpu.memory_space<vmem>>, %arg3: memref<128x128xf32, #tpu.memory_space<vmem>>, %arg4: memref<1x128xf32, #tpu.memory_space<vmem>>, %arg5: memref<128x128xf32, #tpu.memory_space<vmem>>) attributes {dimension_semantics = [#tpu.dimension_semantics<parallel>, #tpu.dimension_semantics<parallel>], iteration_bounds = array<i64: 1, 1>, scalar_prefetch = 0 : i64, scratch_operands = 0 : i64, tpu.core_type = #tpu.core_type<tc>, window_params = [{transform_indices = @transform_0, window_bounds = array<i64: 128, 128>}, {transform_indices = @transform_1, window_bounds = array<i64: 128, 128>}, {transform_indices = @transform_2, window_bounds = array<i64: 1, 128>}, {transform_indices = @transform_3, window_bounds = array<i64: 128, 128>}]} {
    %c0 = arith.constant 0 : index
    %c0_0 = arith.constant 0 : index
    %0 = vector.load %arg2[%c0, %c0_0] : memref<128x128xf32, #tpu.memory_space<vmem>>, vector<128x128xf32>
    %c0_1 = arith.constant 0 : index
    %c0_2 = arith.constant 0 : index
    %1 = vector.load %arg3[%c0_1, %c0_2] : memref<128x128xf32, #tpu.memory_space<vmem>>, vector<128x128xf32>
    %cst = arith.constant dense<0.000000e+00> : vector<128x128xf32>
    %2 = tpu.matmul %0, %1, %cst {dimension_numbers = #tpu.dot_dimension_numbers<[1], [0], [0], [1], [0, 0, 1, 1], [], []>} : vector<128x128xf32>, vector<128x128xf32>, vector<128x128xf32> -> vector<128x128xf32>
    %c0_3 = arith.constant 0 : index
    %c0_4 = arith.constant 0 : index
    %3 = vector.load %arg4[%c0_3, %c0_4] : memref<1x128xf32, #tpu.memory_space<vmem>>, vector<1x128xf32>
    %4 = vector.broadcast %3 : vector<1x128xf32> to vector<128x128xf32>
    %5 = arith.addf %2, %4 : vector<128x128xf32>
    %c0_5 = arith.constant 0 : index
    %c0_6 = arith.constant 0 : index
    %6 = vector.load %arg5[%c0_5, %c0_6] : memref<128x128xf32, #tpu.memory_space<vmem>>, vector<128x128xf32>
    tpu.vector_store %arg5[%c0_5, %c0_6], %5 {strides = array<i32>} : memref<128x128xf32, #tpu.memory_space<vmem>>, vector<128x128xf32>,
    return
  }
  func.func @transform_0(%arg0: i32, %arg1: i32) -> (i32, i32) {
    %c0_i32 = arith.constant 0 : i32
    %c0_i32_0 = arith.constant 0 : i32
    return %arg0, %c0_i32 : i32, i32
  }
  func.func @transform_1(%arg0: i32, %arg1: i32) -> (i32, i32) {
    %c0_i32 = arith.constant 0 : i32
    %c0_i32_0 = arith.constant 0 : i32
    return %c0_i32, %arg1 : i32, i32
  }
  func.func @transform_2(%arg0: i32, %arg1: i32) -> (i32, i32) {
    %c0_i32 = arith.constant 0 : i32
    %c0_i32_0 = arith.constant 0 : i32
    return %c0_i32, %arg1 : i32, i32
  }
  func.func @transform_3(%arg0: i32, %arg1: i32) -> (i32, i32) {
    %c0_i32 = arith.constant 0 : i32
    return %arg0, %arg1 : i32, i32
  }
}

</mosaic_0001>

<bundles_post_ra>
// kernel: pissa_s_forward.1
= control target key start
LH: loop header
LB: loop body
LE: loop exit
PB: predicated region body
PF: predicated region fallthrough
CT: control target
= control target key end

     0   :  { %8 = vsyncpa [#allocation3], 0  ;;  %s599_s0 = inlined_call_operand.hbm [shape: f32[128,128], index: 0, kind: input, shape index: {}]   ;;  %s600_s1 = inlined_call_operand.hbm [shape: f32[128,128], index: 1, kind: input, shape index: {}]   ;;  %s601_s2 = inlined_call_operand.hbm [shape: f32[1,128], index: 2, kind: input, shape index: {}]   ;;  %s602_s3 = inlined_call_operand.hbm [shape: f32[128,128], index: 3, kind: output, shape index: {}]  }
   0x1   :  { %9 = vsyncpa [#allocation6], 0 }
   0x2   :  { %10 = vsyncpa [#allocation4], 0  ;;  %s509_s12 = smov [#allocation5]   ;;  %s510_s14 = smov [#allocation2]  }
   0x3   :  { %s28_s13 = sshll.u32 %s509_s12, 4  ;;  %s16_s15 = sshll.u32 %s510_s14, 4  ;;  %s29_s13 = int_to_ptr.vmem [resolvable:$true] %s28_s13  ;;  %s535_s15 = int_to_ptr.vmem [resolvable:$true] %s16_s15 }
   0x4   :  { %s415_s18 = scalar_lea.hbm %s600_s1, 2048 }
   0x5   :  { %p416_p0 = scmp.ne.s32.totalorder %s600_s1, %s415_s18  ;;  %p419_p1 = scmp.lt.u32.totalorder %s415_s18, %s600_s1 }
   0x7   :  { %p421_p2 = pnand %p419_p1, %p416_p0 }
   0x9   :  { %424 = shalt.err (!%p421_p2)
}
   0xa   :  { %s425_s23 = scalar_lea.vmem %s29_s13, 2048  ;;  %p430_p4 = scmp.lt.s32.totalorder %s29_s13, %s29_s13 }
   0xb   :  { %p426_p3 = scmp.ne.s32.totalorder %s29_s13, %s425_s23  ;;  %p431_p5 = scmp.lt.s32.totalorder %s425_s23, %s425_s23 }
   0xd   :  { %p432_p6 = por %p431_p5, %p430_p4 }
   0xf   :  { %p433_p7 = pnand %p432_p6, %p426_p3 }
  0x11   :  { %436 = shalt.err (!%p433_p7)
}
  0x12   :  { %s511_s24 = smov 128   ;;  %s512_s25 = smov 8  }
  0x13   :  { %34 = dma.hbm_to_vmem [thread:$0]  %s600_s1, 2048, %s29_s13, [#allocation6], %s511_s24, %s511_s24, %s512_s25  }
  0x14   :  { %s437_s30 = scalar_lea.hbm %s599_s0, 2048 }
  0x15   :  { %p438_p8 = scmp.ne.s32.totalorder %s599_s0, %s437_s30  ;;  %p441_p9 = scmp.lt.u32.totalorder %s437_s30, %s599_s0 }
  0x17   :  { %p443_p10 = pnand %p441_p9, %p438_p8 }
  0x19   :  { %446 = shalt.err (!%p443_p10)
}
  0x1a   :  { %s447_s8 = scalar_lea.vmem %s535_s15, 2048  ;;  %p452_p12 = scmp.lt.s32.totalorder %s535_s15, %s535_s15 }
  0x1b   :  { %p448_p11 = scmp.ne.s32.totalorder %s535_s15, %s447_s8  ;;  %p453_p13 = scmp.lt.s32.totalorder %s447_s8, %s447_s8 }
  0x1d   :  { %p454_p0 = por %p453_p13, %p452_p12 }
  0x1f   :  { %p455_p1 = pnand %p454_p0, %p448_p11 }
  0x21   :  { %458 = shalt.err (!%p455_p1)
}
  0x22   :  { %22 = dma.hbm_to_vmem [thread:$0]  %s599_s0, 2048, %s535_s15, [#allocation3], %s511_s24, %s511_s24, %s512_s25  }
  0x23   :  { %s513_s10 = smov [#allocation7]   ;;  %s459_s14 = scalar_lea.hbm %s601_s2, 16 }
  0x24   :  { %s41_s11 = sshll.u32 %s513_s10, 4  ;;  %p460_p2 = scmp.ne.s32.totalorder %s601_s2, %s459_s14  ;;  %s42_s11 = int_to_ptr.vmem [resolvable:$true] %s41_s11 }
  0x25   :  { %p463_p3 = scmp.lt.u32.totalorder %s459_s14, %s601_s2 }
  0x27   :  { %p465_p4 = pnand %p463_p3, %p460_p2 }
  0x29   :  { %468 = shalt.err (!%p465_p4)
}
  0x2a   :  { %s469_s20 = scalar_lea.vmem %s42_s11, 16  ;;  %s473_s0 = scalar_lea.vmem %s42_s11, 32 }
  0x2b   :  { %p470_p5 = scmp.ne.s32.totalorder %s42_s11, %s469_s20  ;;  %p474_p6 = scmp.lt.s32.totalorder %s42_s11, %s42_s11 }
  0x2c   :  { %p475_p7 = scmp.lt.s32.totalorder %s473_s0, %s469_s20 }
  0x2e   :  { %p476_p8 = por %p475_p7, %p474_p6 }
  0x30   :  { %p477_p9 = pnand %p476_p8, %p470_p5 }
  0x32   :  { %480 = shalt.err (!%p477_p9)
}
  0x33   :  { %44 = dma.hbm_to_vmem [thread:$0]  %s601_s2, 16, %s42_s11, [#allocation6]  }
  0x34   :  { %503 = dma.done.wait [#allocation3], 2048  }
  0x35   :  { %504 = vsyncadd [#allocation3], 4294965248 }
  0x36   :  { %505 = dma.done.wait [#allocation6], 2064  }
  0x37   :  { %506 = vsyncadd [#allocation6], 4294965232  ;;  %v70_v0 = vld [vmem:[#allocation5] sm:$0xff]  ;;  %v71_v1 = vld [vmem:[#allocation5 + $0x8] sm:$0xff]  ;;  %s514_s2 = smov [#allocation8]  }
  0x38   :  { %v72_v2 = vld [vmem:[#allocation5 + $0x10] sm:$0xff]  ;;  %v361_v3 = vpack.c.bf16 %v71_v1, %v70_v0  ;;  %v73_v4 = vld [vmem:[#allocation5 + $0x18] sm:$0xff]  ;;  %v74_v6 = vld [vmem:[#allocation5 + $0x20] sm:$0xff]  ;;  %s259_s22 = sshll.u32 %s514_s2, 4  ;;  %s260_s22 = int_to_ptr.vmem [resolvable:$true] %s259_s22 }
  0x39   :  { %v365_v5 = vpack.c.bf16 %v73_v4, %v72_v2  ;;  %v75_v7 = vld [vmem:[#allocation5 + $0x28] sm:$0xff]  ;;  %v54_v9 = vld [vmem:[#allocation2] sm:$0xff]  ;;  %v76_v11 = vld [vmem:[#allocation5 + $0x30] sm:$0xff]  ;;  %s481_s23 = scalar_lea.vmem %s260_s22, 2048  ;;  %p486_p11 = scmp.lt.s32.totalorder %s260_s22, %s260_s22 }
  0x3a   :  { %362 = vmatprep.subr.bf16.mxu0 %v361_v3  ;;  %393 = vmatprep.subr.bf16.mxu1 %v361_v3  ;;  %v369_v8 = vpack.c.bf16 %v75_v7, %v74_v6  ;;  %v62_v10 = vld [vmem:[#allocation2 + $0x40] sm:$0xff]  ;;  %v77_v12 = vld [vmem:[#allocation5 + $0x38] sm:$0xff]  ;;  %v79_v15 = vld [vmem:[#allocation5 + $0x48] sm:$0xff]  ;;  %p482_p10 = scmp.ne.s32.totalorder %s260_s22, %s481_s23  ;;  %p487_p12 = scmp.lt.s32.totalorder %s481_s23, %s481_s23 }
  0x3b   :  { %364 = vmatpush3.bf16.msra.mxu0 %v361_v3  ;;  %401 = vmatpush3.bf16.msra.mxu1 %v361_v3  ;;  %v373_v13 = vpack.c.bf16 %v77_v12, %v76_v11  ;;  %v78_v14 = vld [vmem:[#allocation5 + $0x40] sm:$0xff]  ;;  %v80_v17 = vld [vmem:[#allocation5 + $0x50] sm:$0xff]  ;;  %v81_v18 = vld [vmem:[#allocation5 + $0x58] sm:$0xff] }
  0x3c   :  { %366 = vmatprep.subr.bf16.mxu0 %v365_v5  ;;  %394 = vmatprep.subr.bf16.mxu1 %v365_v5  ;;  %v377_v16 = vpack.c.bf16 %v79_v15, %v78_v14  ;;  %v381_v19 = vpack.c.bf16 %v81_v18, %v80_v17  ;;  %v82_v20 = vld [vmem:[#allocation5 + $0x60] sm:$0xff]  ;;  %v83_v21 = vld [vmem:[#allocation5 + $0x68] sm:$0xff]  ;;  %v84_v23 = vld [vmem:[#allocation5 + $0x70] sm:$0xff]  ;;  %p488_p13 = por %p487_p12, %p486_p11 }
  0x3d   :  { %337 = vmatprep.mubr.f32.mxu0 %v54_v9  ;;  %349 = vmatprep.mubr.f32.mxu1 %v62_v10  ;;  %v385_v22 = vpack.c.bf16 %v83_v21, %v82_v20  ;;  %v85_v24 = vld [vmem:[#allocation5 + $0x78] sm:$0xff]  ;;  %v55_v26 = vld [vmem:[#allocation2 + $0x8] sm:$0xff]  ;;  %v56_v28 = vld [vmem:[#allocation2 + $0x10] sm:$0xff] }
  0x3e   :  { %v389_v25 = vpack.c.bf16 %v85_v24, %v84_v23  ;;  %v63_v27 = vld [vmem:[#allocation2 + $0x48] sm:$0xff]  ;;  %v64_v29 = vld [vmem:[#allocation2 + $0x50] sm:$0xff]  ;;  %v57_v30 = vld [vmem:[#allocation2 + $0x18] sm:$0xff]  ;;  %p489_p0 = pnand %p488_p13, %p482_p10 }
  0x3f   :  { %368 = vmatpush3.bf16.msra.mxu0 %v365_v5  ;;  %402 = vmatpush3.bf16.msra.mxu1 %v365_v5  ;;  %v65_v31 = vld [vmem:[#allocation2 + $0x58] sm:$0xff]  ;;  %v58_v32 = vld [vmem:[#allocation2 + $0x20] sm:$0xff]  ;;  %v59_v34 = vld [vmem:[#allocation2 + $0x28] sm:$0xff] }
  0x40   :  { %370 = vmatprep.subr.bf16.mxu0 %v369_v8  ;;  %395 = vmatprep.subr.bf16.mxu1 %v369_v8  ;;  %v66_v33 = vld [vmem:[#allocation2 + $0x60] sm:$0xff]  ;;  %v67_v35 = vld [vmem:[#allocation2 + $0x68] sm:$0xff]  ;;  %v60_v36 = vld [vmem:[#allocation2 + $0x30] sm:$0xff] }
  0x41   :  { %v68_v37 = vld [vmem:[#allocation2 + $0x70] sm:$0xff]  ;;  %v61_v38 = vld [vmem:[#allocation2 + $0x38] sm:$0xff]  ;;  %v272_v40 = vld [vmem:[#allocation7] ss:$0 sm:$0xff] }
  0x42   :  { %v69_v39 = vld [vmem:[#allocation2 + $0x78] sm:$0xff] }
  0x43   :  { %372 = vmatpush3.bf16.msra.mxu0 %v369_v8  ;;  %403 = vmatpush3.bf16.msra.mxu1 %v369_v8 }
  0x44   :  { %374 = vmatprep.subr.bf16.mxu0 %v373_v13  ;;  %396 = vmatprep.subr.bf16.mxu1 %v373_v13 }
  0x47   :  { %376 = vmatpush3.bf16.msra.mxu0 %v373_v13  ;;  %404 = vmatpush3.bf16.msra.mxu1 %v373_v13 }
  0x48   :  { %378 = vmatprep.subr.bf16.mxu0 %v377_v16  ;;  %397 = vmatprep.subr.bf16.mxu1 %v377_v16 }
  0x4b   :  { %380 = vmatpush3.bf16.msra.mxu0 %v377_v16  ;;  %405 = vmatpush3.bf16.msra.mxu1 %v377_v16 }
  0x4c   :  { %382 = vmatprep.subr.bf16.mxu0 %v381_v19  ;;  %398 = vmatprep.subr.bf16.mxu1 %v381_v19 }
  0x4f   :  { %384 = vmatpush3.bf16.msra.mxu0 %v381_v19  ;;  %406 = vmatpush3.bf16.msra.mxu1 %v381_v19 }
  0x50   :  { %386 = vmatprep.subr.bf16.mxu0 %v385_v22  ;;  %399 = vmatprep.subr.bf16.mxu1 %v385_v22 }
  0x53   :  { %388 = vmatpush3.bf16.msra.mxu0 %v385_v22  ;;  %407 = vmatpush3.bf16.msra.mxu1 %v385_v22 }
  0x54   :  { %390 = vmatprep.subr.bf16.mxu0 %v389_v25  ;;  %400 = vmatprep.subr.bf16.mxu1 %v389_v25 }
  0x57   :  { %392 = vmatpush3.bf16.msra.mxu0 %v389_v25  ;;  %408 = vmatpush3.bf16.msra.mxu1 %v389_v25 }
  0x5a   :  { %338 = vmatmul.mubr.f32.vlgmr.msra.gmra.mrb[0].mxu0 %v55_v26  ;;  %350 = vmatmul.mubr.f32.vlgmr.msra.gmra.mrb[0].mxu1 %v63_v27 }
  0x5b   :  { %340 = vmatprep.mubr.f32.mxu0 %v56_v28  ;;  %352 = vmatprep.mubr.f32.mxu1 %v64_v29 }
  0x5e   :  { %341 = vmatmul.mubr.f32.gmra.mrb[2].mxu0 %v57_v30  ;;  %353 = vmatmul.mubr.f32.gmra.mrb[2].mxu1 %v65_v31 }
  0x5f   :  { %343 = vmatprep.mubr.f32.mxu0 %v58_v32  ;;  %355 = vmatprep.mubr.f32.mxu1 %v66_v33 }
  0x62   :  { %344 = vmatmul.mubr.f32.gmra.mrb[4].mxu0 %v59_v34  ;;  %356 = vmatmul.mubr.f32.gmra.mrb[4].mxu1 %v67_v35 }
  0x63   :  { %346 = vmatprep.mubr.f32.mxu0 %v60_v36  ;;  %358 = vmatprep.mubr.f32.mxu1 %v68_v37 }
  0x66   :  { %347 = vmatmul.mubr.f32.gmra.mrb[6].mxu0 %v61_v38  ;;  %359 = vmatmul.mubr.f32.gmra.mrb[6].mxu1 %v69_v39 }
 0x12d   :  { %v339_v41 = vpop.f32.mrb[0].mxu0  ;;  %v351_v42 = vpop.f32.mrb[0].mxu1 }
 0x12e   :  { %v165_v43 = vadd.f32 %v339_v41, %v272_v40  ;;  %v205_v44 = vadd.f32 %v351_v42, %v272_v40  ;;  %v159_v45 = vpop.f32.mrb[1].mxu0  ;;  %v199_v46 = vpop.f32.mrb[1].mxu1 }
 0x12f   :  { %v160_v47 = vadd.f32 %v272_v40, %v159_v45  ;;  %v200_v48 = vadd.f32 %v272_v40, %v199_v46 }
 0x130   :  { %239 = vst [vmem:[#allocation8 + $0x8] sm:$0xff] %v165_v43  ;;  %247 = vst [vmem:[#allocation8 + $0x48] sm:$0xff] %v205_v44 }
 0x131   :  { %238 = vst [vmem:[#allocation8] sm:$0xff] %v160_v47  ;;  %246 = vst [vmem:[#allocation8 + $0x40] sm:$0xff] %v200_v48  ;;  %v342_v49 = vpop.f32.mrb[2].mxu0  ;;  %v354_v50 = vpop.f32.mrb[2].mxu1 }
 0x132   :  { %v175_v51 = vadd.f32 %v342_v49, %v272_v40  ;;  %v215_v52 = vadd.f32 %v354_v50, %v272_v40  ;;  %v169_v53 = vpop.f32.mrb[3].mxu0  ;;  %v209_v54 = vpop.f32.mrb[3].mxu1 }
 0x133   :  { %v170_v55 = vadd.f32 %v272_v40, %v169_v53  ;;  %v210_v56 = vadd.f32 %v272_v40, %v209_v54 }
 0x134   :  { %241 = vst [vmem:[#allocation8 + $0x18] sm:$0xff] %v175_v51  ;;  %249 = vst [vmem:[#allocation8 + $0x58] sm:$0xff] %v215_v52 }
 0x135   :  { %240 = vst [vmem:[#allocation8 + $0x10] sm:$0xff] %v170_v55  ;;  %248 = vst [vmem:[#allocation8 + $0x50] sm:$0xff] %v210_v56  ;;  %v345_v57 = vpop.f32.mrb[4].mxu0  ;;  %v357_v58 = vpop.f32.mrb[4].mxu1 }
 0x136   :  { %v185_v59 = vadd.f32 %v345_v57, %v272_v40  ;;  %v225_v60 = vadd.f32 %v357_v58, %v272_v40  ;;  %v179_v61 = vpop.f32.mrb[5].mxu0  ;;  %v219_v62 = vpop.f32.mrb[5].mxu1 }
 0x137   :  { %v180_v63 = vadd.f32 %v272_v40, %v179_v61  ;;  %v220_v0 = vadd.f32 %v272_v40, %v219_v62 }
 0x138   :  { %243 = vst [vmem:[#allocation8 + $0x28] sm:$0xff] %v185_v59  ;;  %251 = vst [vmem:[#allocation8 + $0x68] sm:$0xff] %v225_v60 }
 0x139   :  { %242 = vst [vmem:[#allocation8 + $0x20] sm:$0xff] %v180_v63  ;;  %250 = vst [vmem:[#allocation8 + $0x60] sm:$0xff] %v220_v0  ;;  %v348_v1 = vpop.f32.mrb[6].mxu0  ;;  %v360_v2 = vpop.f32.mrb[6].mxu1 }
 0x13a   :  { %v195_v3 = vadd.f32 %v348_v1, %v272_v40  ;;  %v235_v4 = vadd.f32 %v360_v2, %v272_v40  ;;  %v189_v5 = vpop.f32.mrb[7].mxu0  ;;  %v229_v6 = vpop.f32.mrb[7].mxu1 }
 0x13b   :  { %v190_v7 = vadd.f32 %v272_v40, %v189_v5  ;;  %v230_v8 = vadd.f32 %v272_v40, %v229_v6 }
 0x13c   :  { %245 = vst [vmem:[#allocation8 + $0x38] sm:$0xff] %v195_v3  ;;  %253 = vst [vmem:[#allocation8 + $0x78] sm:$0xff] %v235_v4 }
 0x13d   :  { %244 = vst [vmem:[#allocation8 + $0x30] sm:$0xff] %v190_v7  ;;  %252 = vst [vmem:[#allocation8 + $0x70] sm:$0xff] %v230_v8 }
 0x13e   :  { %492 = shalt.err (!%p489_p0)
}
 0x13f   :  { %s493_s28 = scalar_lea.hbm %s602_s3, 2048 }
 0x140   :  { %p494_p1 = scmp.ne.s32.totalorder %s602_s3, %s493_s28  ;;  %p497_p2 = scmp.lt.u32.totalorder %s493_s28, %s602_s3 }
 0x142   :  { %p499_p3 = pnand %p497_p2, %p494_p1 }
 0x144   :  { %502 = shalt.err (!%p499_p3)
}
 0x145   :  { %265 = dma.vmem_to_hbm [thread:$0]  %s260_s22, 2048, %s602_s3, [#allocation4], %s511_s24, %s511_s24, %s512_s25  }
 0x146   :  { %507 = dma.done.wait [#allocation4], 2048  }
 0x147   :  { %508 = vsyncadd [#allocation4], 4294965248 }
 0x148   :  { %269 = vsyncpa [#allocation3], 1 }
 0x149   :  { %270 = vsyncpa [#allocation6], 1 }
 0x14a   :  { %271 = vsyncpa [#allocation4], 1 }

</bundles_post_ra>
